<compile_context>
chip_gen: v7x
topology: tpu7x:2x2x1
jax: 0.10.0
libtpu: 0.0.40
codegen_flags: <defaults>
</compile_context>

<pallas_src>
import functools
import math

import jax
import jax.numpy as jnp
from jax.experimental import pallas as pl
from jax.experimental.pallas import tpu as pltpu


def _round_up(n, m):
    return ((n + m - 1) // m) * m


def _mlp_fused_kernel(*refs, n_layers, activation, compute_dtype):
    """Fused MLP: y = L_{n-1}(act(...act(L_0(x))...)); activations never leave VMEM.

    refs = (x_ref, w_0..w_{L-1}, b_0..b_{L-1}, o_ref); weight j is (Kpad_j, Npad_j)
    with Kpad_j == previous layer's Npad (all lane-padded to multiples of 128).
    """
    x_ref = refs[0]
    w_refs = refs[1:1 + n_layers]
    b_refs = refs[1 + n_layers:1 + 2 * n_layers]
    o_ref = refs[1 + 2 * n_layers]

    h = x_ref[...].astype(jnp.float32)
    for j in range(n_layers):                                   # static unroll (small L)
        y = jnp.dot(h.astype(compute_dtype), w_refs[j][...],    # MXU, f32 accumulate
                    preferred_element_type=jnp.float32)
        y = y + b_refs[j][...]                                   # (1, Npad_j) f32 bias, VPU
        if j != n_layers - 1:
            if activation == "tanh":
                y = jnp.tanh(y)                                  # EUP
            else:
                y = jnp.maximum(y, 0.0)                          # VPU
        h = y
    o_ref[...] = h.astype(o_ref.dtype)                           # lane-dense Dout_pad store


def densenet_forward(x, w_list, b_list, *, activation, d_out,
                     compute_dtype=jnp.float32):
    """x: (B, Din) f32.  w_list[j]: (Kpad_j, Npad_j) compute_dtype.  b_list[j]: (1, Npad_j) f32."""
    B, Din = x.shape
    L = len(w_list)
    din_pad = w_list[0].shape[0]
    dout_pad = w_list[-1].shape[1]

    # --- VMEM footprint model (bytes); 2x weights covers the double-buffer fallback ---
    w_bytes = sum(int(w.size) * w.dtype.itemsize for w in w_list)
    b_bytes = sum(int(b.size) * b.dtype.itemsize for b in b_list)
    widest = max(w.shape[0] + w.shape[1] for w in w_list)

    def footprint(tb_):
        io = 2 * tb_ * (din_pad + dout_pad) * 4      # double-buffered in/out tiles (f32)
        act = 4 * tb_ * widest                        # live h + y inside one layer (f32)
        return 2 * (w_bytes + b_bytes) + io + act

    # --- batch (sublane) padding / tiling ---------------------------------------------
    if B <= 128:
        tb = _round_up(max(B, 8), 8)
    else:
        tb = 128
        cap = _round_up(B, 128)
        budget = 40 << 20                             # conservative vs v7x's 64 MiB/TC
        for cand in (512, 256):
            if cand <= cap and footprint(cand) <= budget:
                tb = cand
                break
    Bp = _round_up(B, tb)

    if (Bp, din_pad) != (B, Din):
        xp = jnp.pad(x.astype(jnp.float32), ((0, Bp - B), (0, din_pad - Din)))
    else:
        xp = x.astype(jnp.float32)

    vmem_limit = int(min(max(footprint(tb) * 1.25, 32 << 20), 100 << 20))

    kernel = functools.partial(_mlp_fused_kernel, n_layers=L,
                               activation=activation, compute_dtype=compute_dtype)

    x_spec = pl.BlockSpec((tb, din_pad), lambda i: (i, 0))
    out_spec = pl.BlockSpec((tb, dout_pad), lambda i: (i, 0))

    def const_specs(single_buffer):
        # Constant index_map -> block never changes; single-buffer it when supported.
        kw = dict(pipeline_mode=pl.Buffered(1)) if single_buffer else {}
        specs = [pl.BlockSpec(w.shape, lambda i: (0, 0), **kw) for w in w_list]
        specs += [pl.BlockSpec(b.shape, lambda i: (0, 0), **kw) for b in b_list]
        return specs

    args = (xp, *w_list, *b_list)
    out = None
    for single_buffer in (True, False):
        try:
            out = pl.pallas_call(
                kernel,
                out_shape=jax.ShapeDtypeStruct((Bp, dout_pad), jnp.float32),
                grid_spec=pltpu.PrefetchScalarGridSpec(
                    num_scalar_prefetch=0,
                    grid=(Bp // tb,),
                    in_specs=[x_spec] + const_specs(single_buffer),
                    out_specs=out_spec,
                ),
                compiler_params=pltpu.CompilerParams(
                    dimension_semantics=("parallel",),   # megacore: TCs split batch tiles
                    vmem_limit_bytes=vmem_limit),
            )(*args)
            break
        except Exception:
            # Fallback: identical kernel with default (double) buffering of the weights.
            if not single_buffer:
                raise
    return out[:B, :d_out]


class DenseNetPallas:
    """JAX/Pallas re-implementation of the PyTorch DenseNet forward pass."""

    def __init__(self, layers, nonlinearity, key, out_nonlinearity=None,
                 normalize=False, compute_dtype=jnp.float32):
        assert not normalize, "normalize=True (BatchNorm1d) not implemented"
        assert out_nonlinearity is None, "out_nonlinearity not implemented"
        nl = nonlinearity.lower()
        if nl not in ("tanh", "relu"):
            raise ValueError(f"{nonlinearity} is not supported")
        self.activation = nl
        self.n_layers = len(layers) - 1
        assert self.n_layers >= 1
        self.d_out = layers[-1]
        self.compute_dtype = compute_dtype

        # Deterministic init mirroring torch.nn.Linear defaults:
        # U(-1/sqrt(fan_in), 1/sqrt(fan_in)) for both weight and bias.
        self.params = []
        for j in range(self.n_layers):
            key, kw, kb = jax.random.split(key, 3)
            fan_in, fan_out = layers[j], layers[j + 1]
            bound = 1.0 / math.sqrt(fan_in)
            # stored as (in, out)  ==  torch weight (out, in) transposed
            w = jax.random.uniform(kw, (fan_in, fan_out), jnp.float32,
                                   minval=-bound, maxval=bound)
            b = jax.random.uniform(kb, (fan_out,), jnp.float32,
                                   minval=-bound, maxval=bound)
            self.params.append((w, b))

        # Per-layer lane-padded weights/biases (each dim rounded up to 128).  Padding is
        # exact: padded input lanes hit zero weight rows, padded output lanes get zero
        # matmul + zero bias, and tanh(0)=relu(0)=0, so padded lanes stay zero everywhere.
        # TODO(synk): on v6e/v7x, consider aligning wide hidden layers to 256 to fill the
        #             2x256x256 MXU when the kernel is MXU-bound in bf16.
        pdims = [_round_up(d, 128) for d in layers]
        self.w_padded, self.b_padded = [], []
        for j, (w, b) in enumerate(self.params):
            wp = jnp.zeros((pdims[j], pdims[j + 1]), jnp.float32)
            wp = wp.at[:w.shape[0], :w.shape[1]].set(w)
            bp = jnp.zeros((1, pdims[j + 1]), jnp.float32).at[0, :b.shape[0]].set(b)
            self.w_padded.append(wp.astype(compute_dtype))   # bf16 MXU operands if requested
            self.b_padded.append(bp)                          # bias / epilogue stay f32

    def __call__(self, x):
        return densenet_forward(x, self.w_padded, self.b_padded,
                                activation=self.activation,
                                d_out=self.d_out,
                                compute_dtype=self.compute_dtype)


def densenet_reference(x, params, activation, n_layers):
    """Pure-JAX reference for correctness checks."""
    for j, (w, b) in enumerate(params):
        x = x @ w + b
        if j != n_layers - 1:
            x = jnp.tanh(x) if activation == "tanh" else jnp.maximum(x, 0.0)
    return x


if __name__ == "__main__":
    key = jax.random.PRNGKey(0)
    key, kx1, kp1, kx2, kp2 = jax.random.split(key, 5)

    # --- test 1: tanh MLP, f32 (matches PyTorch numerics) -----------------------------
    layer_sizes = [16, 32, 32, 8]
    batch = 8
    x1 = jax.random.normal(kx1, (batch, layer_sizes[0]), jnp.float32)
    net = DenseNetPallas(layer_sizes, nonlinearity="tanh", key=kp1)
    out = jax.block_until_ready(net(x1))
    ref = densenet_reference(x1, net.params, net.activation, net.n_layers)
    assert out.shape == (batch, layer_sizes[-1])
    assert jnp.allclose(out, ref, atol=1e-5, rtol=1e-5), "tanh/f32 mismatch vs reference"

    # --- test 2: relu MLP with heterogeneous (per-layer padded) widths ----------------
    layer_sizes2 = [16, 200, 8]      # pads to 128 / 256 / 128 -> exercises ragged padding
    batch2 = 20
    x2 = jax.random.normal(kx2, (batch2, layer_sizes2[0]), jnp.float32)
    net2 = DenseNetPallas(layer_sizes2, nonlinearity="relu", key=kp2)
    out2 = jax.block_until_ready(net2(x2))
    ref2 = densenet_reference(x2, net2.params, net2.activation, net2.n_layers)
    assert out2.shape == (batch2, layer_sizes2[-1])
    assert jnp.allclose(out2, ref2, atol=1e-5, rtol=1e-5), "relu/f32 mismatch vs reference"

    # --- test 3: bf16 MXU operands (f32 accumulate/epilogue), tolerance-checked -------
    net_bf16 = DenseNetPallas(layer_sizes, nonlinearity="tanh", key=kp1,
                              compute_dtype=jnp.bfloat16)
    out_bf16 = jax.block_until_ready(net_bf16(x1))
    assert out_bf16.shape == (batch, layer_sizes[-1])
    assert jnp.allclose(out_bf16, ref, atol=5e-2, rtol=5e-2), "bf16 path too far from f32 ref"

    print("KERNEL_OK")
</pallas_src>

<mosaic_0001>
module attributes {stable_mosaic.version = 11 : i64} {
  func.func @_mlp_fused_kernel(%arg0: i32, %arg1: memref<8x128xf32, #tpu.memory_space<vmem>>, %arg2: memref<128x128xf32, #tpu.memory_space<vmem>>, %arg3: memref<128x128xf32, #tpu.memory_space<vmem>>, %arg4: memref<128x128xf32, #tpu.memory_space<vmem>>, %arg5: memref<1x128xf32, #tpu.memory_space<vmem>>, %arg6: memref<1x128xf32, #tpu.memory_space<vmem>>, %arg7: memref<1x128xf32, #tpu.memory_space<vmem>>, %arg8: memref<8x128xf32, #tpu.memory_space<vmem>>) attributes {dimension_semantics = [#tpu.dimension_semantics<parallel>], iteration_bounds = array<i64: 1>, scalar_prefetch = 0 : i64, scratch_operands = 0 : i64, tpu.core_type = #tpu.core_type<tc>, window_params = [{transform_indices = @transform_0, window_bounds = array<i64: 8, 128>}, {pipeline_mode = #tpu.pipeline_mode<synchronous>, transform_indices = @transform_1, window_bounds = array<i64: 128, 128>}, {pipeline_mode = #tpu.pipeline_mode<synchronous>, transform_indices = @transform_2, window_bounds = array<i64: 128, 128>}, {pipeline_mode = #tpu.pipeline_mode<synchronous>, transform_indices = @transform_3, window_bounds = array<i64: 128, 128>}, {pipeline_mode = #tpu.pipeline_mode<synchronous>, transform_indices = @transform_4, window_bounds = array<i64: 1, 128>}, {pipeline_mode = #tpu.pipeline_mode<synchronous>, transform_indices = @transform_5, window_bounds = array<i64: 1, 128>}, {pipeline_mode = #tpu.pipeline_mode<synchronous>, transform_indices = @transform_6, window_bounds = array<i64: 1, 128>}, {transform_indices = @transform_7, window_bounds = array<i64: 8, 128>}]} {
    %c0 = arith.constant 0 : index
    %c0_0 = arith.constant 0 : index
    %0 = vector.load %arg1[%c0, %c0_0] : memref<8x128xf32, #tpu.memory_space<vmem>>, vector<8x128xf32>
    %c0_1 = arith.constant 0 : index
    %c0_2 = arith.constant 0 : index
    %1 = vector.load %arg2[%c0_1, %c0_2] : memref<128x128xf32, #tpu.memory_space<vmem>>, vector<128x128xf32>
    %cst = arith.constant dense<0.000000e+00> : vector<8x128xf32>
    %2 = tpu.matmul %0, %1, %cst {dimension_numbers = #tpu.dot_dimension_numbers<[1], [0], [0], [1], [0, 0, 1, 1], [], []>} : vector<8x128xf32>, vector<128x128xf32>, vector<8x128xf32> -> vector<8x128xf32>
    %c0_3 = arith.constant 0 : index
    %c0_4 = arith.constant 0 : index
    %3 = vector.load %arg5[%c0_3, %c0_4] : memref<1x128xf32, #tpu.memory_space<vmem>>, vector<1x128xf32>
    %4 = vector.broadcast %3 : vector<1x128xf32> to vector<8x128xf32>
    %5 = arith.addf %2, %4 : vector<8x128xf32>
    %6 = math.tanh %5 : vector<8x128xf32>
    %c0_5 = arith.constant 0 : index
    %c0_6 = arith.constant 0 : index
    %7 = vector.load %arg3[%c0_5, %c0_6] : memref<128x128xf32, #tpu.memory_space<vmem>>, vector<128x128xf32>
    %cst_7 = arith.constant dense<0.000000e+00> : vector<8x128xf32>
    %8 = tpu.matmul %6, %7, %cst_7 {dimension_numbers = #tpu.dot_dimension_numbers<[1], [0], [0], [1], [0, 0, 1, 1], [], []>} : vector<8x128xf32>, vector<128x128xf32>, vector<8x128xf32> -> vector<8x128xf32>
    %c0_8 = arith.constant 0 : index
    %c0_9 = arith.constant 0 : index
    %9 = vector.load %arg6[%c0_8, %c0_9] : memref<1x128xf32, #tpu.memory_space<vmem>>, vector<1x128xf32>
    %10 = vector.broadcast %9 : vector<1x128xf32> to vector<8x128xf32>
    %11 = arith.addf %8, %10 : vector<8x128xf32>
    %12 = math.tanh %11 : vector<8x128xf32>
    %c0_10 = arith.constant 0 : index
    %c0_11 = arith.constant 0 : index
    %13 = vector.load %arg4[%c0_10, %c0_11] : memref<128x128xf32, #tpu.memory_space<vmem>>, vector<128x128xf32>
    %cst_12 = arith.constant dense<0.000000e+00> : vector<8x128xf32>
    %14 = tpu.matmul %12, %13, %cst_12 {dimension_numbers = #tpu.dot_dimension_numbers<[1], [0], [0], [1], [0, 0, 1, 1], [], []>} : vector<8x128xf32>, vector<128x128xf32>, vector<8x128xf32> -> vector<8x128xf32>
    %c0_13 = arith.constant 0 : index
    %c0_14 = arith.constant 0 : index
    %15 = vector.load %arg7[%c0_13, %c0_14] : memref<1x128xf32, #tpu.memory_space<vmem>>, vector<1x128xf32>
    %16 = vector.broadcast %15 : vector<1x128xf32> to vector<8x128xf32>
    %17 = arith.addf %14, %16 : vector<8x128xf32>
    %c0_15 = arith.constant 0 : index
    %c0_16 = arith.constant 0 : index
    %18 = vector.load %arg8[%c0_15, %c0_16] : memref<8x128xf32, #tpu.memory_space<vmem>>, vector<8x128xf32>
    tpu.vector_store %arg8[%c0_15, %c0_16], %17 {strides = array<i32>} : memref<8x128xf32, #tpu.memory_space<vmem>>, vector<8x128xf32>,
    return
  }
  func.func @transform_0(%arg0: i32) -> (i32, i32) {
    %c0_i32 = arith.constant 0 : i32
    %c0_i32_0 = arith.constant 0 : i32
    return %arg0, %c0_i32 : i32, i32
  }
  func.func @transform_1(%arg0: i32) -> (i32, i32) {
    %c0_i32 = arith.constant 0 : i32
    %c0_i32_0 = arith.constant 0 : i32
    %c0_i32_1 = arith.constant 0 : i32
    return %c0_i32, %c0_i32_0 : i32, i32
  }
  func.func @transform_2(%arg0: i32) -> (i32, i32) {
    %c0_i32 = arith.constant 0 : i32
    %c0_i32_0 = arith.constant 0 : i32
    %c0_i32_1 = arith.constant 0 : i32
    return %c0_i32, %c0_i32_0 : i32, i32
  }
  func.func @transform_3(%arg0: i32) -> (i32, i32) {
    %c0_i32 = arith.constant 0 : i32
    %c0_i32_0 = arith.constant 0 : i32
    %c0_i32_1 = arith.constant 0 : i32
    return %c0_i32, %c0_i32_0 : i32, i32
  }
  func.func @transform_4(%arg0: i32) -> (i32, i32) {
    %c0_i32 = arith.constant 0 : i32
    %c0_i32_0 = arith.constant 0 : i32
    %c0_i32_1 = arith.constant 0 : i32
    return %c0_i32, %c0_i32_0 : i32, i32
  }
  func.func @transform_5(%arg0: i32) -> (i32, i32) {
    %c0_i32 = arith.constant 0 : i32
    %c0_i32_0 = arith.constant 0 : i32
    %c0_i32_1 = arith.constant 0 : i32
    return %c0_i32, %c0_i32_0 : i32, i32
  }
  func.func @transform_6(%arg0: i32) -> (i32, i32) {
    %c0_i32 = arith.constant 0 : i32
    %c0_i32_0 = arith.constant 0 : i32
    %c0_i32_1 = arith.constant 0 : i32
    return %c0_i32, %c0_i32_0 : i32, i32
  }
  func.func @transform_7(%arg0: i32) -> (i32, i32) {
    %c0_i32 = arith.constant 0 : i32
    %c0_i32_0 = arith.constant 0 : i32
    return %arg0, %c0_i32 : i32, i32
  }
}

module attributes {stable_mosaic.version = 11 : i64} {
  func.func @_mlp_fused_kernel(%arg0: i32, %arg1: memref<8x128xf32, #tpu.memory_space<vmem>>, %arg2: memref<128x128xf32, #tpu.memory_space<vmem>>, %arg3: memref<128x128xf32, #tpu.memory_space<vmem>>, %arg4: memref<128x128xf32, #tpu.memory_space<vmem>>, %arg5: memref<1x128xf32, #tpu.memory_space<vmem>>, %arg6: memref<1x128xf32, #tpu.memory_space<vmem>>, %arg7: memref<1x128xf32, #tpu.memory_space<vmem>>, %arg8: memref<8x128xf32, #tpu.memory_space<vmem>>) attributes {dimension_semantics = [#tpu.dimension_semantics<parallel>], iteration_bounds = array<i64: 1>, scalar_prefetch = 0 : i64, scratch_operands = 0 : i64, tpu.core_type = #tpu.core_type<tc>, window_params = [{transform_indices = @transform_0, window_bounds = array<i64: 8, 128>}, {pipeline_mode = #tpu.pipeline_mode<synchronous>, transform_indices = @transform_1, window_bounds = array<i64: 128, 128>}, {pipeline_mode = #tpu.pipeline_mode<synchronous>, transform_indices = @transform_2, window_bounds = array<i64: 128, 128>}, {pipeline_mode = #tpu.pipeline_mode<synchronous>, transform_indices = @transform_3, window_bounds = array<i64: 128, 128>}, {pipeline_mode = #tpu.pipeline_mode<synchronous>, transform_indices = @transform_4, window_bounds = array<i64: 1, 128>}, {pipeline_mode = #tpu.pipeline_mode<synchronous>, transform_indices = @transform_5, window_bounds = array<i64: 1, 128>}, {pipeline_mode = #tpu.pipeline_mode<synchronous>, transform_indices = @transform_6, window_bounds = array<i64: 1, 128>}, {transform_indices = @transform_7, window_bounds = array<i64: 8, 128>}]} {
    %c0 = arith.constant 0 : index
    %c0_0 = arith.constant 0 : index
    %0 = vector.load %arg1[%c0, %c0_0] : memref<8x128xf32, #tpu.memory_space<vmem>>, vector<8x128xf32>
    %c0_1 = arith.constant 0 : index
    %c0_2 = arith.constant 0 : index
    %1 = vector.load %arg2[%c0_1, %c0_2] : memref<128x128xf32, #tpu.memory_space<vmem>>, vector<128x128xf32>
    %cst = arith.constant dense<0.000000e+00> : vector<8x128xf32>
    %2 = tpu.matmul %0, %1, %cst {dimension_numbers = #tpu.dot_dimension_numbers<[1], [0], [0], [1], [0, 0, 1, 1], [], []>} : vector<8x128xf32>, vector<128x128xf32>, vector<8x128xf32> -> vector<8x128xf32>
    %c0_3 = arith.constant 0 : index
    %c0_4 = arith.constant 0 : index
    %3 = vector.load %arg5[%c0_3, %c0_4] : memref<1x128xf32, #tpu.memory_space<vmem>>, vector<1x128xf32>
    %4 = vector.broadcast %3 : vector<1x128xf32> to vector<8x128xf32>
    %5 = arith.addf %2, %4 : vector<8x128xf32>
    %6 = math.tanh %5 : vector<8x128xf32>
    %c0_5 = arith.constant 0 : index
    %c0_6 = arith.constant 0 : index
    %7 = vector.load %arg3[%c0_5, %c0_6] : memref<128x128xf32, #tpu.memory_space<vmem>>, vector<128x128xf32>
    %cst_7 = arith.constant dense<0.000000e+00> : vector<8x128xf32>
    %8 = tpu.matmul %6, %7, %cst_7 {dimension_numbers = #tpu.dot_dimension_numbers<[1], [0], [0], [1], [0, 0, 1, 1], [], []>} : vector<8x128xf32>, vector<128x128xf32>, vector<8x128xf32> -> vector<8x128xf32>
    %c0_8 = arith.constant 0 : index
    %c0_9 = arith.constant 0 : index
    %9 = vector.load %arg6[%c0_8, %c0_9] : memref<1x128xf32, #tpu.memory_space<vmem>>, vector<1x128xf32>
    %10 = vector.broadcast %9 : vector<1x128xf32> to vector<8x128xf32>
    %11 = arith.addf %8, %10 : vector<8x128xf32>
    %12 = math.tanh %11 : vector<8x128xf32>
    %c0_10 = arith.constant 0 : index
    %c0_11 = arith.constant 0 : index
    %13 = vector.load %arg4[%c0_10, %c0_11] : memref<128x128xf32, #tpu.memory_space<vmem>>, vector<128x128xf32>
    %cst_12 = arith.constant dense<0.000000e+00> : vector<8x128xf32>
    %14 = tpu.matmul %12, %13, %cst_12 {dimension_numbers = #tpu.dot_dimension_numbers<[1], [0], [0], [1], [0, 0, 1, 1], [], []>} : vector<8x128xf32>, vector<128x128xf32>, vector<8x128xf32> -> vector<8x128xf32>
    %c0_13 = arith.constant 0 : index
    %c0_14 = arith.constant 0 : index
    %15 = vector.load %arg7[%c0_13, %c0_14] : memref<1x128xf32, #tpu.memory_space<vmem>>, vector<1x128xf32>
    %16 = vector.broadcast %15 : vector<1x128xf32> to vector<8x128xf32>
    %17 = arith.addf %14, %16 : vector<8x128xf32>
    %c0_15 = arith.constant 0 : index
    %c0_16 = arith.constant 0 : index
    %18 = vector.load %arg8[%c0_15, %c0_16] : memref<8x128xf32, #tpu.memory_space<vmem>>, vector<8x128xf32>
    tpu.vector_store %arg8[%c0_15, %c0_16], %17 {strides = array<i32>} : memref<8x128xf32, #tpu.memory_space<vmem>>, vector<8x128xf32>,
    return
  }
  func.func @transform_0(%arg0: i32) -> (i32, i32) {
    %c0_i32 = arith.constant 0 : i32
    %c0_i32_0 = arith.constant 0 : i32
    return %arg0, %c0_i32 : i32, i32
  }
  func.func @transform_1(%arg0: i32) -> (i32, i32) {
    %c0_i32 = arith.constant 0 : i32
    %c0_i32_0 = arith.constant 0 : i32
    %c0_i32_1 = arith.constant 0 : i32
    return %c0_i32, %c0_i32_0 : i32, i32
  }
  func.func @transform_2(%arg0: i32) -> (i32, i32) {
    %c0_i32 = arith.constant 0 : i32
    %c0_i32_0 = arith.constant 0 : i32
    %c0_i32_1 = arith.constant 0 : i32
    return %c0_i32, %c0_i32_0 : i32, i32
  }
  func.func @transform_3(%arg0: i32) -> (i32, i32) {
    %c0_i32 = arith.constant 0 : i32
    %c0_i32_0 = arith.constant 0 : i32
    %c0_i32_1 = arith.constant 0 : i32
    return %c0_i32, %c0_i32_0 : i32, i32
  }
  func.func @transform_4(%arg0: i32) -> (i32, i32) {
    %c0_i32 = arith.constant 0 : i32
    %c0_i32_0 = arith.constant 0 : i32
    %c0_i32_1 = arith.constant 0 : i32
    return %c0_i32, %c0_i32_0 : i32, i32
  }
  func.func @transform_5(%arg0: i32) -> (i32, i32) {
    %c0_i32 = arith.constant 0 : i32
    %c0_i32_0 = arith.constant 0 : i32
    %c0_i32_1 = arith.constant 0 : i32
    return %c0_i32, %c0_i32_0 : i32, i32
  }
  func.func @transform_6(%arg0: i32) -> (i32, i32) {
    %c0_i32 = arith.constant 0 : i32
    %c0_i32_0 = arith.constant 0 : i32
    %c0_i32_1 = arith.constant 0 : i32
    return %c0_i32, %c0_i32_0 : i32, i32
  }
  func.func @transform_7(%arg0: i32) -> (i32, i32) {
    %c0_i32 = arith.constant 0 : i32
    %c0_i32_0 = arith.constant 0 : i32
    return %arg0, %c0_i32 : i32, i32
  }
}

</mosaic_0001>

<bundles_post_ra>
// kernel: tpu_custom_call.1
= control target key start
LH: loop header
LB: loop body
LE: loop exit
PB: predicated region body
PF: predicated region fallthrough
CT: control target
= control target key end

     0   :  { %12 = vsyncpa [#allocation3], 0  ;;  %s901_s0 = inlined_call_operand.hbm [shape: f32[8,128], index: 0, kind: input, shape index: {}]   ;;  %s902_s1 = inlined_call_operand.hbm [shape: f32[128,128], index: 1, kind: input, shape index: {}]   ;;  %s903_s2 = inlined_call_operand.hbm [shape: f32[128,128], index: 2, kind: input, shape index: {}]   ;;  %s904_s3 = inlined_call_operand.hbm [shape: f32[128,128], index: 3, kind: input, shape index: {}]   ;;  %s905_s4 = inlined_call_operand.vmem [shape: f32[1,128], index: 4, kind: input, shape index: {}]   ;;  %s906_s5 = inlined_call_operand.vmem [shape: f32[1,128], index: 5, kind: input, shape index: {}]   ;;  %s907_s6 = inlined_call_operand.vmem [shape: f32[1,128], index: 6, kind: input, shape index: {}]   ;;  %s908_s7 = inlined_call_operand.hbm [shape: f32[8,128], index: 7, kind: output, shape index: {}]  }
   0x1   :  { %13 = vsyncpa [#allocation6], 0 }
   0x2   :  { %14 = vsyncpa [#allocation9], 0 }
   0x3   :  { %15 = vsyncpa [#allocation4], 0  ;;  %s743_s24 = smov [#allocation5]   ;;  %s625_s28 = scalar_lea.hbm %s902_s1, 2048 }
   0x4   :  { %s31_s25 = sshll.u32 %s743_s24, 4  ;;  %p626_p0 = scmp.ne.s32.totalorder %s902_s1, %s625_s28  ;;  %s32_s25 = int_to_ptr.vmem [resolvable:$true] %s31_s25 }
   0x5   :  { %p629_p1 = scmp.lt.u32.totalorder %s625_s28, %s902_s1 }
   0x7   :  { %p631_p2 = pnand %p629_p1, %p626_p0 }
   0x9   :  { %634 = shalt.err (!%p631_p2)
}
   0xa   :  { %s635_s10 = scalar_lea.vmem %s32_s25, 2048  ;;  %p640_p4 = scmp.lt.s32.totalorder %s32_s25, %s32_s25 }
   0xb   :  { %p636_p3 = scmp.ne.s32.totalorder %s32_s25, %s635_s10  ;;  %p641_p5 = scmp.lt.s32.totalorder %s635_s10, %s635_s10 }
   0xd   :  { %p642_p6 = por %p641_p5, %p640_p4 }
   0xf   :  { %p643_p7 = pnand %p642_p6, %p636_p3 }
  0x11   :  { %646 = shalt.err (!%p643_p7)
}
  0x12   :  { %s744_s11 = smov 128   ;;  %s745_s12 = smov 8  }
  0x13   :  { %37 = dma.hbm_to_vmem [thread:$0]  %s902_s1, 2048, %s32_s25, [#allocation6], %s744_s11, %s744_s11, %s745_s12  }
  0x14   :  { %s746_s15 = smov [#allocation2]   ;;  %s747_s17 = smov [#allocation7]  }
  0x15   :  { %s22_s16 = sshll.u32 %s746_s15, 4  ;;  %s43_s18 = sshll.u32 %s747_s17, 4  ;;  %s23_s16 = int_to_ptr.vmem [resolvable:$true] %s22_s16  ;;  %s44_s18 = int_to_ptr.vmem [resolvable:$true] %s43_s18 }
  0x16   :  { %s647_s21 = scalar_lea.hbm %s901_s0, 128 }
  0x17   :  { %p648_p8 = scmp.ne.s32.totalorder %s901_s0, %s647_s21  ;;  %p651_p9 = scmp.lt.u32.totalorder %s647_s21, %s901_s0 }
  0x19   :  { %p653_p10 = pnand %p651_p9, %p648_p8 }
  0x1b   :  { %656 = shalt.err (!%p653_p10)
}
  0x1c   :  { %s657_s1 = scalar_lea.vmem %s23_s16, 128  ;;  %p662_p12 = scmp.lt.s32.totalorder %s23_s16, %s23_s16 }
  0x1d   :  { %p658_p11 = scmp.ne.s32.totalorder %s23_s16, %s657_s1  ;;  %p663_p13 = scmp.lt.s32.totalorder %s657_s1, %s657_s1 }
  0x1f   :  { %p664_p0 = por %p663_p13, %p662_p12 }
  0x21   :  { %p665_p1 = pnand %p664_p0, %p658_p11 }
  0x23   :  { %668 = shalt.err (!%p665_p1)
}
  0x24   :  { %25 = dma.hbm_to_vmem [thread:$0]  %s901_s0, 128, %s23_s16, [#allocation3]  }
  0x25   :  { %s669_s30 = scalar_lea.hbm %s903_s2, 2048 }
  0x26   :  { %p670_p2 = scmp.ne.s32.totalorder %s903_s2, %s669_s30  ;;  %p673_p3 = scmp.lt.u32.totalorder %s669_s30, %s903_s2 }
  0x28   :  { %p675_p4 = pnand %p673_p3, %p670_p2 }
  0x2a   :  { %678 = shalt.err (!%p675_p4)
}
  0x2b   :  { %s679_s14 = scalar_lea.vmem %s44_s18, 2048  ;;  %p684_p6 = scmp.lt.s32.totalorder %s44_s18, %s44_s18 }
  0x2c   :  { %p680_p5 = scmp.ne.s32.totalorder %s44_s18, %s679_s14  ;;  %p685_p7 = scmp.lt.s32.totalorder %s679_s14, %s679_s14 }
  0x2e   :  { %p686_p8 = por %p685_p7, %p684_p6 }
  0x30   :  { %p687_p9 = pnand %p686_p8, %p680_p5 }
  0x32   :  { %690 = shalt.err (!%p687_p9)
}
  0x33   :  { %49 = dma.hbm_to_vmem [thread:$0]  %s903_s2, 2048, %s44_s18, [#allocation6], %s744_s11, %s744_s11, %s745_s12  }
  0x34   :  { %s748_s16 = smov [#allocation8]   ;;  %s691_s21 = scalar_lea.hbm %s904_s3, 2048 }
  0x35   :  { %s55_s17 = sshll.u32 %s748_s16, 4  ;;  %p692_p10 = scmp.ne.s32.totalorder %s904_s3, %s691_s21  ;;  %s56_s17 = int_to_ptr.vmem [resolvable:$true] %s55_s17 }
  0x36   :  { %p695_p11 = scmp.lt.u32.totalorder %s691_s21, %s904_s3 }
  0x38   :  { %p697_p12 = pnand %p695_p11, %p692_p10 }
  0x3a   :  { %700 = shalt.err (!%p697_p12)
}
  0x3b   :  { %s701_s1 = scalar_lea.vmem %s56_s17, 2048  ;;  %p706_p0 = scmp.lt.s32.totalorder %s56_s17, %s56_s17 }
  0x3c   :  { %p702_p13 = scmp.ne.s32.totalorder %s56_s17, %s701_s1  ;;  %p707_p1 = scmp.lt.s32.totalorder %s701_s1, %s701_s1 }
  0x3e   :  { %p708_p2 = por %p707_p1, %p706_p0 }
  0x40   :  { %p709_p3 = pnand %p708_p2, %p702_p13 }
  0x42   :  { %712 = shalt.err (!%p709_p3)
}
  0x43   :  { %61 = dma.hbm_to_vmem [thread:$0]  %s904_s3, 2048, %s56_s17, [#allocation9], %s744_s11, %s744_s11, %s745_s12  }
  0x44   :  { %735 = dma.done.wait [#allocation3], 128  }
  0x45   :  { %736 = vsyncadd [#allocation3], 4294967168 }
  0x46   :  { %737 = dma.done.wait [#allocation6], 4096  }
  0x47   :  { %738 = vsyncadd [#allocation6], 4294963200 }
  0x48   :  { %739 = dma.done.wait [#allocation9], 2048  }
  0x49   :  { %740 = vsyncadd [#allocation9], 4294965248  ;;  %v749_v0 = vmov 0.0|0.0   ;;  %vm750_vm0 = vmmov 0   ;;  %v751_v1 = vmov 0.0   ;;  %v81_v2 = vld [vmem:[#allocation5] sm:$0xff] }
  0x4a   :  { %539 = vmatprep.subr.bf16.mxu0 %v749_v0  ;;  %466 = vmatprep.mubr.msk.f32.mxu0 %vm750_vm0, %v751_v1  ;;  %v82_v3 = vld [vmem:[#allocation5 + $0x8] sm:$0xff]  ;;  %v83_v4 = vld [vmem:[#allocation5 + $0x10] sm:$0xff]  ;;  %v84_v6 = vld [vmem:[#allocation5 + $0x18] sm:$0xff]  ;;  %s752_s28 = smov [#allocation10]  }
  0x4b   :  { %563 = vmatprep.subr.bf16.mxu1 %v749_v0  ;;  %501 = vmatprep.mubr.msk.f32.mxu1 %vm750_vm0, %v751_v1  ;;  %v540_v5 = vpack.c.bf16 %v82_v3, %v81_v2  ;;  %v543_v7 = vpack.c.bf16 %v84_v6, %v83_v4  ;;  %v85_v8 = vld [vmem:[#allocation5 + $0x20] sm:$0xff]  ;;  %v86_v9 = vld [vmem:[#allocation5 + $0x28] sm:$0xff]  ;;  %v177_v12 = vld [vmem:[#allocation7 + $0x10] sm:$0xff]  ;;  %s369_s29 = sshll.u32 %s752_s28, 4  ;;  %s370_s29 = int_to_ptr.vmem [resolvable:$true] %s369_s29 }
  0x4c   :  { %v175_v10 = vld [vmem:[#allocation7] sm:$0xff]  ;;  %v176_v11 = vld [vmem:[#allocation7 + $0x8] sm:$0xff]  ;;  %v178_v13 = vld [vmem:[#allocation7 + $0x18] sm:$0xff]  ;;  %v546_v14 = vpack.c.bf16 %v86_v9, %v85_v8  ;;  %s713_s30 = scalar_lea.vmem %s370_s29, 128  ;;  %p718_p5 = scmp.lt.s32.totalorder %s370_s29, %s370_s29 }
  0x4d   :  { %541 = vmatpush3.bf16.msra.mxu0 %v540_v5  ;;  %v564_v15 = vpack.c.bf16 %v176_v11, %v175_v10  ;;  %v87_v16 = vld [vmem:[#allocation5 + $0x30] sm:$0xff]  ;;  %v88_v17 = vld [vmem:[#allocation5 + $0x38] sm:$0xff]  ;;  %v567_v18 = vpack.c.bf16 %v178_v13, %v177_v12  ;;  %v179_v19 = vld [vmem:[#allocation7 + $0x20] sm:$0xff]  ;;  %p714_p4 = scmp.ne.s32.totalorder %s370_s29, %s713_s30  ;;  %p719_p6 = scmp.lt.s32.totalorder %s713_s30, %s713_s30 }
  0x4e   :  { %542 = vmatprep.subr.bf16.mxu0 %v749_v0  ;;  %v180_v20 = vld [vmem:[#allocation7 + $0x28] sm:$0xff]  ;;  %v549_v21 = vpack.c.bf16 %v88_v17, %v87_v16  ;;  %v89_v22 = vld [vmem:[#allocation5 + $0x40] sm:$0xff]  ;;  %v181_v25 = vld [vmem:[#allocation7 + $0x30] sm:$0xff] }
  0x4f   :  { %565 = vmatpush3.bf16.msra.mxu1 %v564_v15  ;;  %v90_v23 = vld [vmem:[#allocation5 + $0x48] sm:$0xff]  ;;  %v570_v24 = vpack.c.bf16 %v180_v20, %v179_v19  ;;  %v182_v26 = vld [vmem:[#allocation7 + $0x38] sm:$0xff]  ;;  %v91_v28 = vld [vmem:[#allocation5 + $0x50] sm:$0xff]  ;;  %p720_p7 = por %p719_p6, %p718_p5 }
  0x50   :  { %566 = vmatprep.subr.bf16.mxu1 %v749_v0  ;;  %v552_v27 = vpack.c.bf16 %v90_v23, %v89_v22  ;;  %v92_v29 = vld [vmem:[#allocation5 + $0x58] sm:$0xff]  ;;  %v573_v30 = vpack.c.bf16 %v182_v26, %v181_v25  ;;  %v183_v31 = vld [vmem:[#allocation7 + $0x40] sm:$0xff]  ;;  %v184_v32 = vld [vmem:[#allocation7 + $0x48] sm:$0xff] }
  0x51   :  { %544 = vmatpush3.bf16.msra.mxu0 %v543_v7  ;;  %v555_v33 = vpack.c.bf16 %v92_v29, %v91_v28  ;;  %v93_v34 = vld [vmem:[#allocation5 + $0x60] sm:$0xff]  ;;  %v94_v35 = vld [vmem:[#allocation5 + $0x68] sm:$0xff]  ;;  %v576_v36 = vpack.c.bf16 %v184_v32, %v183_v31  ;;  %v95_v38 = vld [vmem:[#allocation5 + $0x70] sm:$0xff]  ;;  %p721_p8 = pnand %p720_p7, %p714_p4 }
  0x52   :  { %545 = vmatprep.subr.bf16.mxu0 %v749_v0  ;;  %v558_v37 = vpack.c.bf16 %v94_v35, %v93_v34  ;;  %v96_v39 = vld [vmem:[#allocation5 + $0x78] sm:$0xff]  ;;  %v185_v42 = vld [vmem:[#allocation7 + $0x50] sm:$0xff]  ;;  %v187_v45 = vld [vmem:[#allocation7 + $0x60] sm:$0xff] }
  0x53   :  { %568 = vmatpush3.bf16.msra.mxu1 %v567_v18  ;;  %v561_v40 = vpack.c.bf16 %v96_v39, %v95_v38  ;;  %v80_v41 = vld [vmem:[#allocation2] sm:$0xff]  ;;  %v188_v46 = vld [vmem:[#allocation7 + $0x68] sm:$0xff]  ;;  %v189_v48 = vld [vmem:[#allocation7 + $0x70] sm:$0xff] }
  0x54   :  { %569 = vmatprep.subr.bf16.mxu1 %v749_v0  ;;  %v186_v43 = vld [vmem:[#allocation7 + $0x58] sm:$0xff]  ;;  %v582_v47 = vpack.c.bf16 %v188_v46, %v187_v45  ;;  %v269_v51 = vld [vmem:[#allocation8] sm:$0xff]  ;;  %v270_v52 = vld [vmem:[#allocation8 + $0x8] sm:$0xff] }
  0x55   :  { %547 = vmatpush3.bf16.msra.mxu0 %v546_v14  ;;  %v579_v44 = vpack.c.bf16 %v186_v43, %v185_v42  ;;  %v190_v49 = vld [vmem:[#allocation7 + $0x78] sm:$0xff]  ;;  %v271_v53 = vld [vmem:[#allocation8 + $0x10] sm:$0xff]  ;;  %v588_v54 = vpack.c.bf16 %v270_v52, %v269_v51  ;;  %v273_v57 = vld [vmem:[#allocation8 + $0x20] sm:$0xff] }
  0x56   :  { %548 = vmatprep.subr.bf16.mxu0 %v749_v0  ;;  %v585_v50 = vpack.c.bf16 %v190_v49, %v189_v48  ;;  %v272_v55 = vld [vmem:[#allocation8 + $0x18] sm:$0xff]  ;;  %v274_v58 = vld [vmem:[#allocation8 + $0x28] sm:$0xff]  ;;  %v275_v60 = vld [vmem:[#allocation8 + $0x30] sm:$0xff] }
  0x57   :  { %571 = vmatpush3.bf16.msra.mxu1 %v570_v24  ;;  %v591_v56 = vpack.c.bf16 %v272_v55, %v271_v53  ;;  %v594_v59 = vpack.c.bf16 %v274_v58, %v273_v57  ;;  %v276_v61 = vld [vmem:[#allocation8 + $0x38] sm:$0xff]  ;;  %v277_v63 = vld [vmem:[#allocation8 + $0x40] sm:$0xff]  ;;  %v279_v8 = vld [vmem:[#allocation8 + $0x50] sm:$0xff] }
  0x58   :  { %572 = vmatprep.subr.bf16.mxu1 %v749_v0  ;;  %v597_v62 = vpack.c.bf16 %v276_v61, %v275_v60  ;;  %v380_v3 = vld [vmem:[%s905_s4] ss:$0 sm:$0xff]  ;;  %v281_v11 = vld [vmem:[#allocation8 + $0x60] sm:$0xff]  ;;  %v282_v12 = vld [vmem:[#allocation8 + $0x68] sm:$0xff] }
  0x59   :  { %550 = vmatpush3.bf16.msra.mxu0 %v549_v21  ;;  %v280_v9 = vld [vmem:[#allocation8 + $0x58] sm:$0xff]  ;;  %v606_v13 = vpack.c.bf16 %v282_v12, %v281_v11  ;;  %v283_v14 = vld [vmem:[#allocation8 + $0x70] sm:$0xff] }
  0x5a   :  { %551 = vmatprep.subr.bf16.mxu0 %v749_v0  ;;  %v603_v10 = vpack.c.bf16 %v280_v9, %v279_v8  ;;  %v284_v15 = vld [vmem:[#allocation8 + $0x78] sm:$0xff] }
  0x5b   :  { %574 = vmatpush3.bf16.msra.mxu1 %v573_v30  ;;  %v609_v16 = vpack.c.bf16 %v284_v15, %v283_v14  ;;  %v381_v17 = vld [vmem:[%s906_s5] ss:$0 sm:$0xff] }
  0x5c   :  { %575 = vmatprep.subr.bf16.mxu1 %v749_v0  ;;  %v382_v22 = vld [vmem:[%s907_s6] ss:$0 sm:$0xff] }
  0x5d   :  { %553 = vmatpush3.bf16.msra.mxu0 %v552_v27 }
  0x5e   :  { %554 = vmatprep.subr.bf16.mxu0 %v749_v0 }
  0x5f   :  { %577 = vmatpush3.bf16.msra.mxu1 %v576_v36 }
  0x60   :  { %578 = vmatprep.subr.bf16.mxu1 %v749_v0 }
  0x61   :  { %556 = vmatpush3.bf16.msra.mxu0 %v555_v33 }
  0x62   :  { %557 = vmatprep.subr.bf16.mxu0 %v749_v0 }
  0x63   :  { %580 = vmatpush3.bf16.msra.mxu1 %v579_v44 }
  0x64   :  { %581 = vmatprep.subr.bf16.mxu1 %v749_v0 }
  0x65   :  { %559 = vmatpush3.bf16.msra.mxu0 %v558_v37 }
  0x66   :  { %560 = vmatprep.subr.bf16.mxu0 %v749_v0 }
  0x67   :  { %583 = vmatpush3.bf16.msra.mxu1 %v582_v47 }
  0x68   :  { %584 = vmatprep.subr.bf16.mxu1 %v749_v0 }
  0x69   :  { %562 = vmatpush3.bf16.msra.mxu0 %v561_v40 }
  0x6a   :  { %587 = vmatprep.subr.bf16.mxu0 %v749_v0 }
  0x6b   :  { %586 = vmatpush3.bf16.msra.mxu1 %v585_v50 }
  0x6c   :  { %467 = vmatmul.mubr.f32.vlgmr.msra.gmra.mrb[0].mxu0 %v80_v41 }
  0x6d   :  { %536 = vmatprep.mubr.msk.f32.mxu0 %vm750_vm0, %v751_v1  ;;  %589 = vmatpush3.bf16.msra.mxu0 %v588_v54  ;;  %v278_v1 = vld [vmem:[#allocation8 + $0x48] sm:$0xff] }
  0x6e   :  { %590 = vmatprep.subr.bf16.mxu0 %v749_v0  ;;  %v600_v2 = vpack.c.bf16 %v278_v1, %v277_v63 }
  0x71   :  { %592 = vmatpush3.bf16.msra.mxu0 %v591_v56 }
  0x72   :  { %593 = vmatprep.subr.bf16.mxu0 %v749_v0 }
  0x75   :  { %595 = vmatpush3.bf16.msra.mxu0 %v594_v59 }
  0x76   :  { %596 = vmatprep.subr.bf16.mxu0 %v749_v0 }
  0x79   :  { %598 = vmatpush3.bf16.msra.mxu0 %v597_v62 }
  0x7a   :  { %599 = vmatprep.subr.bf16.mxu0 %v749_v0 }
  0x7d   :  { %601 = vmatpush3.bf16.msra.mxu0 %v600_v2 }
  0x7e   :  { %602 = vmatprep.subr.bf16.mxu0 %v749_v0 }
  0x81   :  { %604 = vmatpush3.bf16.msra.mxu0 %v603_v10 }
  0x82   :  { %605 = vmatprep.subr.bf16.mxu0 %v749_v0 }
  0x85   :  { %607 = vmatpush3.bf16.msra.mxu0 %v606_v13 }
  0x86   :  { %608 = vmatprep.subr.bf16.mxu0 %v749_v0 }
  0x89   :  { %610 = vmatpush3.bf16.msra.mxu0 %v609_v16 }
 0x13f   :  { %v170_v4 = vpop.f32.mrb[0].mxu0 }
 0x140   :  { %v171_v5 = vadd.f32 %v380_v3, %v170_v4  ;;  %v468_v6 = vpop.f32.mrb[1].mxu0 }
 0x142   :  { %621 = vtanh.f32 %v171_v5 }
 0x14c   :  { %v622_v7 = vpop.eup %621 }
 0x14d   :  { %502 = vmatmul.mubr.f32.vlgmr.msra.gmra.mrb[0].mxu1 %v622_v7 }
 0x220   :  { %v264_v18 = vpop.f32.mrb[0].mxu1 }
 0x221   :  { %v265_v19 = vadd.f32 %v381_v17, %v264_v18  ;;  %v503_v20 = vpop.f32.mrb[1].mxu1 }
 0x223   :  { %623 = vtanh.f32 %v265_v19 }
 0x22d   :  { %v624_v21 = vpop.eup %623 }
 0x22e   :  { %537 = vmatmul.mubr.f32.vlgmr.msra.gmra.mrb[2].mxu0 %v624_v21 }
 0x301   :  { %v358_v23 = vpop.f32.mrb[2].mxu0 }
 0x302   :  { %v359_v24 = vadd.f32 %v382_v22, %v358_v23  ;;  %v538_v0 = vpop.f32.mrb[3].mxu0 }
 0x304   :  { %362 = vst [vmem:[#allocation10] sm:$0xff] %v359_v24 }
 0x305   :  { %724 = shalt.err (!%p721_p8)
}
 0x306   :  { %s725_s9 = scalar_lea.hbm %s908_s7, 128 }
 0x307   :  { %p726_p9 = scmp.ne.s32.totalorder %s908_s7, %s725_s9  ;;  %p729_p10 = scmp.lt.u32.totalorder %s725_s9, %s908_s7 }
 0x309   :  { %p731_p11 = pnand %p729_p10, %p726_p9 }
 0x30b   :  { %734 = shalt.err (!%p731_p11)
}
 0x30c   :  { %372 = dma.vmem_to_hbm [thread:$0]  %s370_s29, 128, %s908_s7, [#allocation4]  }
 0x30d   :  { %741 = dma.done.wait [#allocation4], 128  }
 0x30e   :  { %742 = vsyncadd [#allocation4], 4294967168 }
 0x30f   :  { %376 = vsyncpa [#allocation3], 1 }
 0x310   :  { %377 = vsyncpa [#allocation6], 1 }
 0x311   :  { %378 = vsyncpa [#allocation9], 1 }
 0x312   :  { %379 = vsyncpa [#allocation4], 1 }

// kernel: tpu_custom_call.1
= control target key start
LH: loop header
LB: loop body
LE: loop exit
PB: predicated region body
PF: predicated region fallthrough
CT: control target
= control target key end

     0   :  { %12 = vsyncpa [#allocation3], 0  ;;  %s901_s0 = inlined_call_operand.hbm [shape: f32[8,128], index: 0, kind: input, shape index: {}]   ;;  %s902_s1 = inlined_call_operand.hbm [shape: f32[128,128], index: 1, kind: input, shape index: {}]   ;;  %s903_s2 = inlined_call_operand.hbm [shape: f32[128,128], index: 2, kind: input, shape index: {}]   ;;  %s904_s3 = inlined_call_operand.hbm [shape: f32[128,128], index: 3, kind: input, shape index: {}]   ;;  %s905_s4 = inlined_call_operand.vmem [shape: f32[1,128], index: 4, kind: input, shape index: {}]   ;;  %s906_s5 = inlined_call_operand.vmem [shape: f32[1,128], index: 5, kind: input, shape index: {}]   ;;  %s907_s6 = inlined_call_operand.vmem [shape: f32[1,128], index: 6, kind: input, shape index: {}]   ;;  %s908_s7 = inlined_call_operand.hbm [shape: f32[8,128], index: 7, kind: output, shape index: {}]  }
   0x1   :  { %13 = vsyncpa [#allocation6], 0 }
   0x2   :  { %14 = vsyncpa [#allocation9], 0 }
   0x3   :  { %15 = vsyncpa [#allocation4], 0  ;;  %s743_s24 = smov [#allocation5]   ;;  %s625_s28 = scalar_lea.hbm %s902_s1, 2048 }
   0x4   :  { %s31_s25 = sshll.u32 %s743_s24, 4  ;;  %p626_p0 = scmp.ne.s32.totalorder %s902_s1, %s625_s28  ;;  %s32_s25 = int_to_ptr.vmem [resolvable:$true] %s31_s25 }
   0x5   :  { %p629_p1 = scmp.lt.u32.totalorder %s625_s28, %s902_s1 }
   0x7   :  { %p631_p2 = pnand %p629_p1, %p626_p0 }
   0x9   :  { %634 = shalt.err (!%p631_p2)
}
   0xa   :  { %s635_s10 = scalar_lea.vmem %s32_s25, 2048  ;;  %p640_p4 = scmp.lt.s32.totalorder %s32_s25, %s32_s25 }
   0xb   :  { %p636_p3 = scmp.ne.s32.totalorder %s32_s25, %s635_s10  ;;  %p641_p5 = scmp.lt.s32.totalorder %s635_s10, %s635_s10 }
   0xd   :  { %p642_p6 = por %p641_p5, %p640_p4 }
   0xf   :  { %p643_p7 = pnand %p642_p6, %p636_p3 }
  0x11   :  { %646 = shalt.err (!%p643_p7)
}
  0x12   :  { %s744_s11 = smov 128   ;;  %s745_s12 = smov 8  }
  0x13   :  { %37 = dma.hbm_to_vmem [thread:$0]  %s902_s1, 2048, %s32_s25, [#allocation6], %s744_s11, %s744_s11, %s745_s12  }
  0x14   :  { %s746_s15 = smov [#allocation2]   ;;  %s747_s17 = smov [#allocation7]  }
  0x15   :  { %s22_s16 = sshll.u32 %s746_s15, 4  ;;  %s43_s18 = sshll.u32 %s747_s17, 4  ;;  %s23_s16 = int_to_ptr.vmem [resolvable:$true] %s22_s16  ;;  %s44_s18 = int_to_ptr.vmem [resolvable:$true] %s43_s18 }
  0x16   :  { %s647_s21 = scalar_lea.hbm %s901_s0, 128 }
  0x17   :  { %p648_p8 = scmp.ne.s32.totalorder %s901_s0, %s647_s21  ;;  %p651_p9 = scmp.lt.u32.totalorder %s647_s21, %s901_s0 }
  0x19   :  { %p653_p10 = pnand %p651_p9, %p648_p8 }
  0x1b   :  { %656 = shalt.err (!%p653_p10)
}
  0x1c   :  { %s657_s1 = scalar_lea.vmem %s23_s16, 128  ;;  %p662_p12 = scmp.lt.s32.totalorder %s23_s16, %s23_s16 }
  0x1d   :  { %p658_p11 = scmp.ne.s32.totalorder %s23_s16, %s657_s1  ;;  %p663_p13 = scmp.lt.s32.totalorder %s657_s1, %s657_s1 }
  0x1f   :  { %p664_p0 = por %p663_p13, %p662_p12 }
  0x21   :  { %p665_p1 = pnand %p664_p0, %p658_p11 }
  0x23   :  { %668 = shalt.err (!%p665_p1)
}
  0x24   :  { %25 = dma.hbm_to_vmem [thread:$0]  %s901_s0, 128, %s23_s16, [#allocation3]  }
  0x25   :  { %s669_s30 = scalar_lea.hbm %s903_s2, 2048 }
  0x26   :  { %p670_p2 = scmp.ne.s32.totalorder %s903_s2, %s669_s30  ;;  %p673_p3 = scmp.lt.u32.totalorder %s669_s30, %s903_s2 }
  0x28   :  { %p675_p4 = pnand %p673_p3, %p670_p2 }
  0x2a   :  { %678 = shalt.err (!%p675_p4)
}
  0x2b   :  { %s679_s14 = scalar_lea.vmem %s44_s18, 2048  ;;  %p684_p6 = scmp.lt.s32.totalorder %s44_s18, %s44_s18 }
  0x2c   :  { %p680_p5 = scmp.ne.s32.totalorder %s44_s18, %s679_s14  ;;  %p685_p7 = scmp.lt.s32.totalorder %s679_s14, %s679_s14 }
  0x2e   :  { %p686_p8 = por %p685_p7, %p684_p6 }
  0x30   :  { %p687_p9 = pnand %p686_p8, %p680_p5 }
  0x32   :  { %690 = shalt.err (!%p687_p9)
}
  0x33   :  { %49 = dma.hbm_to_vmem [thread:$0]  %s903_s2, 2048, %s44_s18, [#allocation6], %s744_s11, %s744_s11, %s745_s12  }
  0x34   :  { %s748_s16 = smov [#allocation8]   ;;  %s691_s21 = scalar_lea.hbm %s904_s3, 2048 }
  0x35   :  { %s55_s17 = sshll.u32 %s748_s16, 4  ;;  %p692_p10 = scmp.ne.s32.totalorder %s904_s3, %s691_s21  ;;  %s56_s17 = int_to_ptr.vmem [resolvable:$true] %s55_s17 }
  0x36   :  { %p695_p11 = scmp.lt.u32.totalorder %s691_s21, %s904_s3 }
  0x38   :  { %p697_p12 = pnand %p695_p11, %p692_p10 }
  0x3a   :  { %700 = shalt.err (!%p697_p12)
}
  0x3b   :  { %s701_s1 = scalar_lea.vmem %s56_s17, 2048  ;;  %p706_p0 = scmp.lt.s32.totalorder %s56_s17, %s56_s17 }
  0x3c   :  { %p702_p13 = scmp.ne.s32.totalorder %s56_s17, %s701_s1  ;;  %p707_p1 = scmp.lt.s32.totalorder %s701_s1, %s701_s1 }
  0x3e   :  { %p708_p2 = por %p707_p1, %p706_p0 }
  0x40   :  { %p709_p3 = pnand %p708_p2, %p702_p13 }
  0x42   :  { %712 = shalt.err (!%p709_p3)
}
  0x43   :  { %61 = dma.hbm_to_vmem [thread:$0]  %s904_s3, 2048, %s56_s17, [#allocation9], %s744_s11, %s744_s11, %s745_s12  }
  0x44   :  { %735 = dma.done.wait [#allocation3], 128  }
  0x45   :  { %736 = vsyncadd [#allocation3], 4294967168 }
  0x46   :  { %737 = dma.done.wait [#allocation6], 4096  }
  0x47   :  { %738 = vsyncadd [#allocation6], 4294963200 }
  0x48   :  { %739 = dma.done.wait [#allocation9], 2048  }
  0x49   :  { %740 = vsyncadd [#allocation9], 4294965248  ;;  %v749_v0 = vmov 0.0|0.0   ;;  %vm750_vm0 = vmmov 0   ;;  %v751_v1 = vmov 0.0   ;;  %v81_v2 = vld [vmem:[#allocation5] sm:$0xff] }
  0x4a   :  { %539 = vmatprep.subr.bf16.mxu0 %v749_v0  ;;  %466 = vmatprep.mubr.msk.f32.mxu0 %vm750_vm0, %v751_v1  ;;  %v82_v3 = vld [vmem:[#allocation5 + $0x8] sm:$0xff]  ;;  %v83_v4 = vld [vmem:[#allocation5 + $0x10] sm:$0xff]  ;;  %v84_v6 = vld [vmem:[#allocation5 + $0x18] sm:$0xff]  ;;  %s752_s28 = smov [#allocation10]  }
  0x4b   :  { %563 = vmatprep.subr.bf16.mxu1 %v749_v0  ;;  %501 = vmatprep.mubr.msk.f32.mxu1 %vm750_vm0, %v751_v1  ;;  %v540_v5 = vpack.c.bf16 %v82_v3, %v81_v2  ;;  %v543_v7 = vpack.c.bf16 %v84_v6, %v83_v4  ;;  %v85_v8 = vld [vmem:[#allocation5 + $0x20] sm:$0xff]  ;;  %v86_v9 = vld [vmem:[#allocation5 + $0x28] sm:$0xff]  ;;  %v177_v12 = vld [vmem:[#allocation7 + $0x10] sm:$0xff]  ;;  %s369_s29 = sshll.u32 %s752_s28, 4  ;;  %s370_s29 = int_to_ptr.vmem [resolvable:$true] %s369_s29 }
  0x4c   :  { %v175_v10 = vld [vmem:[#allocation7] sm:$0xff]  ;;  %v176_v11 = vld [vmem:[#allocation7 + $0x8] sm:$0xff]  ;;  %v178_v13 = vld [vmem:[#allocation7 + $0x18] sm:$0xff]  ;;  %v546_v14 = vpack.c.bf16 %v86_v9, %v85_v8  ;;  %s713_s30 = scalar_lea.vmem %s370_s29, 128  ;;  %p718_p5 = scmp.lt.s32.totalorder %s370_s29, %s370_s29 }
  0x4d   :  { %541 = vmatpush3.bf16.msra.mxu0 %v540_v5  ;;  %v564_v15 = vpack.c.bf16 %v176_v11, %v175_v10  ;;  %v87_v16 = vld [vmem:[#allocation5 + $0x30] sm:$0xff]  ;;  %v88_v17 = vld [vmem:[#allocation5 + $0x38] sm:$0xff]  ;;  %v567_v18 = vpack.c.bf16 %v178_v13, %v177_v12  ;;  %v179_v19 = vld [vmem:[#allocation7 + $0x20] sm:$0xff]  ;;  %p714_p4 = scmp.ne.s32.totalorder %s370_s29, %s713_s30  ;;  %p719_p6 = scmp.lt.s32.totalorder %s713_s30, %s713_s30 }
  0x4e   :  { %542 = vmatprep.subr.bf16.mxu0 %v749_v0  ;;  %v180_v20 = vld [vmem:[#allocation7 + $0x28] sm:$0xff]  ;;  %v549_v21 = vpack.c.bf16 %v88_v17, %v87_v16  ;;  %v89_v22 = vld [vmem:[#allocation5 + $0x40] sm:$0xff]  ;;  %v181_v25 = vld [vmem:[#allocation7 + $0x30] sm:$0xff] }
  0x4f   :  { %565 = vmatpush3.bf16.msra.mxu1 %v564_v15  ;;  %v90_v23 = vld [vmem:[#allocation5 + $0x48] sm:$0xff]  ;;  %v570_v24 = vpack.c.bf16 %v180_v20, %v179_v19  ;;  %v182_v26 = vld [vmem:[#allocation7 + $0x38] sm:$0xff]  ;;  %v91_v28 = vld [vmem:[#allocation5 + $0x50] sm:$0xff]  ;;  %p720_p7 = por %p719_p6, %p718_p5 }
  0x50   :  { %566 = vmatprep.subr.bf16.mxu1 %v749_v0  ;;  %v552_v27 = vpack.c.bf16 %v90_v23, %v89_v22  ;;  %v92_v29 = vld [vmem:[#allocation5 + $0x58] sm:$0xff]  ;;  %v573_v30 = vpack.c.bf16 %v182_v26, %v181_v25  ;;  %v183_v31 = vld [vmem:[#allocation7 + $0x40] sm:$0xff]  ;;  %v184_v32 = vld [vmem:[#allocation7 + $0x48] sm:$0xff] }
  0x51   :  { %544 = vmatpush3.bf16.msra.mxu0 %v543_v7  ;;  %v555_v33 = vpack.c.bf16 %v92_v29, %v91_v28  ;;  %v93_v34 = vld [vmem:[#allocation5 + $0x60] sm:$0xff]  ;;  %v94_v35 = vld [vmem:[#allocation5 + $0x68] sm:$0xff]  ;;  %v576_v36 = vpack.c.bf16 %v184_v32, %v183_v31  ;;  %v95_v38 = vld [vmem:[#allocation5 + $0x70] sm:$0xff]  ;;  %p721_p8 = pnand %p720_p7, %p714_p4 }
  0x52   :  { %545 = vmatprep.subr.bf16.mxu0 %v749_v0  ;;  %v558_v37 = vpack.c.bf16 %v94_v35, %v93_v34  ;;  %v96_v39 = vld [vmem:[#allocation5 + $0x78] sm:$0xff]  ;;  %v185_v42 = vld [vmem:[#allocation7 + $0x50] sm:$0xff]  ;;  %v187_v45 = vld [vmem:[#allocation7 + $0x60] sm:$0xff] }
  0x53   :  { %568 = vmatpush3.bf16.msra.mxu1 %v567_v18  ;;  %v561_v40 = vpack.c.bf16 %v96_v39, %v95_v38  ;;  %v80_v41 = vld [vmem:[#allocation2] sm:$0xff]  ;;  %v188_v46 = vld [vmem:[#allocation7 + $0x68] sm:$0xff]  ;;  %v189_v48 = vld [vmem:[#allocation7 + $0x70] sm:$0xff] }
  0x54   :  { %569 = vmatprep.subr.bf16.mxu1 %v749_v0  ;;  %v186_v43 = vld [vmem:[#allocation7 + $0x58] sm:$0xff]  ;;  %v582_v47 = vpack.c.bf16 %v188_v46, %v187_v45  ;;  %v269_v51 = vld [vmem:[#allocation8] sm:$0xff]  ;;  %v270_v52 = vld [vmem:[#allocation8 + $0x8] sm:$0xff] }
  0x55   :  { %547 = vmatpush3.bf16.msra.mxu0 %v546_v14  ;;  %v579_v44 = vpack.c.bf16 %v186_v43, %v185_v42  ;;  %v190_v49 = vld [vmem:[#allocation7 + $0x78] sm:$0xff]  ;;  %v271_v53 = vld [vmem:[#allocation8 + $0x10] sm:$0xff]  ;;  %v588_v54 = vpack.c.bf16 %v270_v52, %v269_v51  ;;  %v273_v57 = vld [vmem:[#allocation8 + $0x20] sm:$0xff] }
  0x56   :  { %548 = vmatprep.subr.bf16.mxu0 %v749_v0  ;;  %v585_v50 = vpack.c.bf16 %v190_v49, %v189_v48  ;;  %v272_v55 = vld [vmem:[#allocation8 + $0x18] sm:$0xff]  ;;  %v274_v58 = vld [vmem:[#allocation8 + $0x28] sm:$0xff]  ;;  %v275_v60 = vld [vmem:[#allocation8 + $0x30] sm:$0xff] }
  0x57   :  { %571 = vmatpush3.bf16.msra.mxu1 %v570_v24  ;;  %v591_v56 = vpack.c.bf16 %v272_v55, %v271_v53  ;;  %v594_v59 = vpack.c.bf16 %v274_v58, %v273_v57  ;;  %v276_v61 = vld [vmem:[#allocation8 + $0x38] sm:$0xff]  ;;  %v277_v63 = vld [vmem:[#allocation8 + $0x40] sm:$0xff]  ;;  %v279_v8 = vld [vmem:[#allocation8 + $0x50] sm:$0xff] }
  0x58   :  { %572 = vmatprep.subr.bf16.mxu1 %v749_v0  ;;  %v597_v62 = vpack.c.bf16 %v276_v61, %v275_v60  ;;  %v380_v3 = vld [vmem:[%s905_s4] ss:$0 sm:$0xff]  ;;  %v281_v11 = vld [vmem:[#allocation8 + $0x60] sm:$0xff]  ;;  %v282_v12 = vld [vmem:[#allocation8 + $0x68] sm:$0xff] }
  0x59   :  { %550 = vmatpush3.bf16.msra.mxu0 %v549_v21  ;;  %v280_v9 = vld [vmem:[#allocation8 + $0x58] sm:$0xff]  ;;  %v606_v13 = vpack.c.bf16 %v282_v12, %v281_v11  ;;  %v283_v14 = vld [vmem:[#allocation8 + $0x70] sm:$0xff] }
  0x5a   :  { %551 = vmatprep.subr.bf16.mxu0 %v749_v0  ;;  %v603_v10 = vpack.c.bf16 %v280_v9, %v279_v8  ;;  %v284_v15 = vld [vmem:[#allocation8 + $0x78] sm:$0xff] }
  0x5b   :  { %574 = vmatpush3.bf16.msra.mxu1 %v573_v30  ;;  %v609_v16 = vpack.c.bf16 %v284_v15, %v283_v14  ;;  %v381_v17 = vld [vmem:[%s906_s5] ss:$0 sm:$0xff] }
  0x5c   :  { %575 = vmatprep.subr.bf16.mxu1 %v749_v0  ;;  %v382_v22 = vld [vmem:[%s907_s6] ss:$0 sm:$0xff] }
  0x5d   :  { %553 = vmatpush3.bf16.msra.mxu0 %v552_v27 }
  0x5e   :  { %554 = vmatprep.subr.bf16.mxu0 %v749_v0 }
  0x5f   :  { %577 = vmatpush3.bf16.msra.mxu1 %v576_v36 }
  0x60   :  { %578 = vmatprep.subr.bf16.mxu1 %v749_v0 }
  0x61   :  { %556 = vmatpush3.bf16.msra.mxu0 %v555_v33 }
  0x62   :  { %557 = vmatprep.subr.bf16.mxu0 %v749_v0 }
  0x63   :  { %580 = vmatpush3.bf16.msra.mxu1 %v579_v44 }
  0x64   :  { %581 = vmatprep.subr.bf16.mxu1 %v749_v0 }
  0x65   :  { %559 = vmatpush3.bf16.msra.mxu0 %v558_v37 }
  0x66   :  { %560 = vmatprep.subr.bf16.mxu0 %v749_v0 }
  0x67   :  { %583 = vmatpush3.bf16.msra.mxu1 %v582_v47 }
  0x68   :  { %584 = vmatprep.subr.bf16.mxu1 %v749_v0 }
  0x69   :  { %562 = vmatpush3.bf16.msra.mxu0 %v561_v40 }
  0x6a   :  { %587 = vmatprep.subr.bf16.mxu0 %v749_v0 }
  0x6b   :  { %586 = vmatpush3.bf16.msra.mxu1 %v585_v50 }
  0x6c   :  { %467 = vmatmul.mubr.f32.vlgmr.msra.gmra.mrb[0].mxu0 %v80_v41 }
  0x6d   :  { %536 = vmatprep.mubr.msk.f32.mxu0 %vm750_vm0, %v751_v1  ;;  %589 = vmatpush3.bf16.msra.mxu0 %v588_v54  ;;  %v278_v1 = vld [vmem:[#allocation8 + $0x48] sm:$0xff] }
  0x6e   :  { %590 = vmatprep.subr.bf16.mxu0 %v749_v0  ;;  %v600_v2 = vpack.c.bf16 %v278_v1, %v277_v63 }
  0x71   :  { %592 = vmatpush3.bf16.msra.mxu0 %v591_v56 }
  0x72   :  { %593 = vmatprep.subr.bf16.mxu0 %v749_v0 }
  0x75   :  { %595 = vmatpush3.bf16.msra.mxu0 %v594_v59 }
  0x76   :  { %596 = vmatprep.subr.bf16.mxu0 %v749_v0 }
  0x79   :  { %598 = vmatpush3.bf16.msra.mxu0 %v597_v62 }
  0x7a   :  { %599 = vmatprep.subr.bf16.mxu0 %v749_v0 }
  0x7d   :  { %601 = vmatpush3.bf16.msra.mxu0 %v600_v2 }
  0x7e   :  { %602 = vmatprep.subr.bf16.mxu0 %v749_v0 }
  0x81   :  { %604 = vmatpush3.bf16.msra.mxu0 %v603_v10 }
  0x82   :  { %605 = vmatprep.subr.bf16.mxu0 %v749_v0 }
  0x85   :  { %607 = vmatpush3.bf16.msra.mxu0 %v606_v13 }
  0x86   :  { %608 = vmatprep.subr.bf16.mxu0 %v749_v0 }
  0x89   :  { %610 = vmatpush3.bf16.msra.mxu0 %v609_v16 }
 0x13f   :  { %v170_v4 = vpop.f32.mrb[0].mxu0 }
 0x140   :  { %v171_v5 = vadd.f32 %v380_v3, %v170_v4  ;;  %v468_v6 = vpop.f32.mrb[1].mxu0 }
 0x142   :  { %621 = vtanh.f32 %v171_v5 }
 0x14c   :  { %v622_v7 = vpop.eup %621 }
 0x14d   :  { %502 = vmatmul.mubr.f32.vlgmr.msra.gmra.mrb[0].mxu1 %v622_v7 }
 0x220   :  { %v264_v18 = vpop.f32.mrb[0].mxu1 }
 0x221   :  { %v265_v19 = vadd.f32 %v381_v17, %v264_v18  ;;  %v503_v20 = vpop.f32.mrb[1].mxu1 }
 0x223   :  { %623 = vtanh.f32 %v265_v19 }
 0x22d   :  { %v624_v21 = vpop.eup %623 }
 0x22e   :  { %537 = vmatmul.mubr.f32.vlgmr.msra.gmra.mrb[2].mxu0 %v624_v21 }
 0x301   :  { %v358_v23 = vpop.f32.mrb[2].mxu0 }
 0x302   :  { %v359_v24 = vadd.f32 %v382_v22, %v358_v23  ;;  %v538_v0 = vpop.f32.mrb[3].mxu0 }
 0x304   :  { %362 = vst [vmem:[#allocation10] sm:$0xff] %v359_v24 }
 0x305   :  { %724 = shalt.err (!%p721_p8)
}
 0x306   :  { %s725_s9 = scalar_lea.hbm %s908_s7, 128 }
 0x307   :  { %p726_p9 = scmp.ne.s32.totalorder %s908_s7, %s725_s9  ;;  %p729_p10 = scmp.lt.u32.totalorder %s725_s9, %s908_s7 }
 0x309   :  { %p731_p11 = pnand %p729_p10, %p726_p9 }
 0x30b   :  { %734 = shalt.err (!%p731_p11)
}
 0x30c   :  { %372 = dma.vmem_to_hbm [thread:$0]  %s370_s29, 128, %s908_s7, [#allocation4]  }
 0x30d   :  { %741 = dma.done.wait [#allocation4], 128  }
 0x30e   :  { %742 = vsyncadd [#allocation4], 4294967168 }
 0x30f   :  { %376 = vsyncpa [#allocation3], 1 }
 0x310   :  { %377 = vsyncpa [#allocation6], 1 }
 0x311   :  { %378 = vsyncpa [#allocation9], 1 }
 0x312   :  { %379 = vsyncpa [#allocation4], 1 }

</bundles_post_ra>
